<compile_context>
chip_gen: v5e
topology: v5e:2x2
jax: 0.10.0
libtpu: 0.0.40
codegen_flags: <defaults>
</compile_context>

<pallas_src>
import functools

import jax
import jax.numpy as jnp
from jax.experimental import pallas as pl
from jax.experimental.pallas import tpu as pltpu


def _round_up(x: int, m: int) -> int:
    return ((x + m - 1) // m) * m


def _layernorm_kernel(eps: float, n_features: int, n_pad_lanes: int):
    """Kernel over a (row_tile, f_pad) block. Padded lanes of x are zero."""

    def kernel(x_ref, gb_ref, o_ref):
        x = x_ref[...].astype(jnp.float32)                    # (T, Fp)
        gamma = gb_ref[0:1, :].astype(jnp.float32)            # (1, Fp), pad lanes = 0
        beta = gb_ref[1:2, :].astype(jnp.float32)             # (1, Fp), pad lanes = 0

        # mean over the *real* features; padded lanes contribute 0 to the sum.
        mean = jnp.sum(x, axis=-1, keepdims=True) * jnp.float32(1.0 / n_features)
        diff = x - mean                                       # padded lanes: -mean

        ssq = jnp.sum(diff * diff, axis=-1, keepdims=True)
        if n_pad_lanes:
            # remove the exact padded-lane contribution (n_pad * mean^2).
            ssq = ssq - jnp.float32(n_pad_lanes) * (mean * mean)

        # torch.std default: unbiased estimator (ddof=1).
        var = ssq * jnp.float32(1.0 / (n_features - 1))
        std = jnp.sqrt(var)

        # per-row reciprocal turns the (T, Fp) divide into a multiply.
        # approx=False keeps full precision (matches the torch reference).
        inv = pl.reciprocal(std + jnp.float32(eps), approx=False)   # (T, 1)

        out = diff * inv * gamma + beta                       # padded lanes -> 0
        o_ref[...] = out.astype(o_ref.dtype)

    return kernel


def _choose_row_tile(rows: int, f_pad: int, row_align: int) -> int:
    """Largest row tile (<=2048) whose VMEM footprint stays comfortably small.

    Conservative per-row budget: double-buffered input + output plus f32
    intermediates inside the kernel (~7 f32 copies of a row). Cap the total at
    ~28 MiB so it fits v7x's 64 MiB physical VMEM (and the 40 MiB scoped limit
    we request) with headroom; v5e/v6e have 128 MiB so they are never tighter.
    """
    budget_bytes = 28 * 1024 * 1024
    per_row_bytes = f_pad * 4 * 7
    t = 2048
    while t > row_align and t * per_row_bytes > budget_bytes:
        t //= 2
    # keep at least 2 grid steps so the "parallel" axis can feed both v7x TCs
    # (and the pipeline has something to overlap) whenever rows allow it.
    while t > row_align and pl.cdiv(rows, t) < 2:
        t //= 2
    return max(t, row_align)


def layer_norm(x: jax.Array, gamma: jax.Array, beta: jax.Array,
               eps: float = 1e-6, row_tile: int | None = None,
               vmem_limit_bytes: int = 40 * 1024 * 1024) -> jax.Array:
    """LayerNorm over the last axis of x (batch, seq, features)."""
    b, s, f = x.shape
    assert f > 1, "unbiased std (ddof=1) requires features > 1"
    rows = b * s

    # Lane-dense feature axis: pad to a multiple of 128.
    f_pad = _round_up(max(f, 128), 128)
    n_pad_lanes = f_pad - f

    # Sublane alignment for the row axis: 8 for f32, 16 for bf16, 32 for int8.
    itemsize = jnp.dtype(x.dtype).itemsize
    row_align = 8 * max(1, 4 // max(itemsize, 1))

    if row_tile is None:
        row_tile = _choose_row_tile(rows, f_pad, row_align)
    row_tile = _round_up(row_tile, row_align)
    rows_pad = _round_up(rows, row_tile)

    x2 = x.reshape(rows, f)
    if rows_pad != rows or f_pad != f:
        x2 = jnp.pad(x2, ((0, rows_pad - rows), (0, f_pad - f)))

    # Fused parameter block: row 0 = gamma, row 1 = beta; padded lanes zero.
    params = jnp.zeros((2, f_pad), jnp.float32)
    params = params.at[0, :f].set(gamma.reshape(f).astype(jnp.float32))
    params = params.at[1, :f].set(beta.reshape(f).astype(jnp.float32))

    grid = (rows_pad // row_tile,)

    out2 = pl.pallas_call(
        _layernorm_kernel(eps, f, n_pad_lanes),
        out_shape=jax.ShapeDtypeStruct((rows_pad, f_pad), x.dtype),
        grid_spec=pltpu.PrefetchScalarGridSpec(
            num_scalar_prefetch=0,
            grid=grid,
            in_specs=[
                pl.BlockSpec((row_tile, f_pad), lambda i: (i, 0)),
                pl.BlockSpec((2, f_pad), lambda i: (0, 0)),   # VMEM-resident params
            ],
            out_specs=pl.BlockSpec((row_tile, f_pad), lambda i: (i, 0)),
        ),
        compiler_params=pltpu.CompilerParams(
            dimension_semantics=("parallel",),
            vmem_limit_bytes=vmem_limit_bytes,
        ),
    )(x2, params)

    return out2[:rows, :f].reshape(b, s, f)


if __name__ == "__main__":
    # Deterministic parameters (as in __init__: gamma=ones, beta=zeros).
    batch, seq, features = 2, 8, 32
    eps = 1e-6

    key = jax.random.PRNGKey(0)
    x = jax.random.normal(key, (batch, seq, features), dtype=jnp.float32)
    gamma = jnp.ones((features,), dtype=jnp.float32)
    beta = jnp.zeros((features,), dtype=jnp.float32)

    out = layer_norm(x, gamma, beta, eps=eps)
    jax.block_until_ready(out)

    # Reference check in plain JAX (same unbiased-std semantics as torch).
    mean = jnp.mean(x, axis=-1, keepdims=True)
    std = jnp.std(x, axis=-1, keepdims=True, ddof=1)
    ref = gamma * (x - mean) / (std + eps) + beta
    assert out.shape == ref.shape, "shape mismatch vs reference"
    assert jnp.allclose(out, ref, atol=1e-5, rtol=1e-5), "mismatch vs reference"

    print("KERNEL_OK")
</pallas_src>

<mosaic_0001>
module attributes {stable_mosaic.version = 11 : i64} {
  func.func @kernel(%arg0: i32, %arg1: memref<8x128xf32, #tpu.memory_space<vmem>>, %arg2: memref<2x128xf32, #tpu.memory_space<vmem>>, %arg3: memref<8x128xf32, #tpu.memory_space<vmem>>) attributes {dimension_semantics = [#tpu.dimension_semantics<parallel>], iteration_bounds = array<i64: 2>, scalar_prefetch = 0 : i64, scratch_operands = 0 : i64, tpu.core_type = #tpu.core_type<tc>, window_params = [{transform_indices = @transform_0, window_bounds = array<i64: 8, 128>}, {pipeline_mode = #tpu.pipeline_mode<synchronous>, transform_indices = @transform_1, window_bounds = array<i64: 2, 128>}, {transform_indices = @transform_2, window_bounds = array<i64: 8, 128>}]} {
    %c0 = arith.constant 0 : index
    %c0_0 = arith.constant 0 : index
    %0 = vector.load %arg1[%c0, %c0_0] : memref<8x128xf32, #tpu.memory_space<vmem>>, vector<8x128xf32>
    %c0_1 = arith.constant 0 : index
    %c0_2 = arith.constant 0 : index
    %1 = vector.load %arg2[%c0_1, %c0_2] : memref<2x128xf32, #tpu.memory_space<vmem>>, vector<1x128xf32>
    %c1 = arith.constant 1 : index
    %c0_3 = arith.constant 0 : index
    %2 = vector.load %arg2[%c1, %c0_3] : memref<2x128xf32, #tpu.memory_space<vmem>>, vector<1x128xf32>
    %cst = arith.constant dense<0.000000e+00> : vector<8xf32>
    %3 = vector.multi_reduction <add>, %0, %cst [1] : vector<8x128xf32> to vector<8xf32>
    %4 = vector.shape_cast %3 : vector<8xf32> to vector<8x1xf32>
    %cst_4 = arith.constant 3.125000e-02 : f32
    %5 = vector.broadcast %cst_4 : f32 to vector<8x1xf32>
    %6 = arith.mulf %4, %5 : vector<8x1xf32>
    %7 = vector.broadcast %6 : vector<8x1xf32> to vector<8x128xf32>
    %8 = arith.subf %0, %7 : vector<8x128xf32>
    %9 = arith.mulf %8, %8 : vector<8x128xf32>
    %cst_5 = arith.constant dense<0.000000e+00> : vector<8xf32>
    %10 = vector.multi_reduction <add>, %9, %cst_5 [1] : vector<8x128xf32> to vector<8xf32>
    %11 = vector.shape_cast %10 : vector<8xf32> to vector<8x1xf32>
    %12 = arith.mulf %6, %6 : vector<8x1xf32>
    %cst_6 = arith.constant 9.600000e+01 : f32
    %13 = vector.broadcast %cst_6 : f32 to vector<8x1xf32>
    %14 = arith.mulf %13, %12 : vector<8x1xf32>
    %15 = arith.subf %11, %14 : vector<8x1xf32>
    %cst_7 = arith.constant 0.0322580636 : f32
    %16 = vector.broadcast %cst_7 : f32 to vector<8x1xf32>
    %17 = arith.mulf %15, %16 : vector<8x1xf32>
    %18 = math.sqrt %17 : vector<8x1xf32>
    %cst_8 = arith.constant 9.99999997E-7 : f32
    %19 = vector.broadcast %cst_8 : f32 to vector<8x1xf32>
    %20 = arith.addf %18, %19 : vector<8x1xf32>
    %21 = tpu.reciprocal %20 : vector<8x1xf32> -> vector<8x1xf32>
    %22 = vector.broadcast %21 : vector<8x1xf32> to vector<8x128xf32>
    %23 = arith.mulf %8, %22 : vector<8x128xf32>
    %24 = vector.broadcast %1 : vector<1x128xf32> to vector<8x128xf32>
    %25 = arith.mulf %23, %24 : vector<8x128xf32>
    %26 = vector.broadcast %2 : vector<1x128xf32> to vector<8x128xf32>
    %27 = arith.addf %25, %26 : vector<8x128xf32>
    %c0_9 = arith.constant 0 : index
    %c0_10 = arith.constant 0 : index
    %28 = vector.load %arg3[%c0_9, %c0_10] : memref<8x128xf32, #tpu.memory_space<vmem>>, vector<8x128xf32>
    tpu.vector_store %arg3[%c0_9, %c0_10], %27 {strides = array<i32>} : memref<8x128xf32, #tpu.memory_space<vmem>>, vector<8x128xf32>,
    return
  }
  func.func @transform_0(%arg0: i32) -> (i32, i32) {
    %c0_i32 = arith.constant 0 : i32
    %c0_i32_0 = arith.constant 0 : i32
    return %arg0, %c0_i32 : i32, i32
  }
  func.func @transform_1(%arg0: i32) -> (i32, i32) {
    %c0_i32 = arith.constant 0 : i32
    %c0_i32_0 = arith.constant 0 : i32
    %c0_i32_1 = arith.constant 0 : i32
    return %c0_i32, %c0_i32_0 : i32, i32
  }
  func.func @transform_2(%arg0: i32) -> (i32, i32) {
    %c0_i32 = arith.constant 0 : i32
    %c0_i32_0 = arith.constant 0 : i32
    return %arg0, %c0_i32 : i32, i32
  }
}

</mosaic_0001>

<bundles_post_ra>
// kernel: tpu_custom_call.1
= control target key start
LH: loop header
LB: loop body
LE: loop exit
PB: predicated region body
PF: predicated region fallthrough
CT: control target
= control target key end

     0   :  { %7 = vsyncpa [#allocation3], 0  ;;  %s686_s0 = inlined_call_operand.hbm [shape: f32[16,128], index: 0, kind: input, shape index: {}]   ;;  %s687_s1 = inlined_call_operand.hbm [shape: f32[2,128], index: 1, kind: input, shape index: {}]   ;;  %s688_s2 = inlined_call_operand.hbm [shape: f32[16,128], index: 2, kind: output, shape index: {}]  }
   0x1   :  { %9 = vsyncpa [#allocation3 + $0x1], 0 }
   0x2   :  { %10 = vsyncpa [#allocation6], 0 }
   0x3   :  { %11 = vsyncpa [#allocation4], 0 }
   0x4   :  { %13 = vsyncpa [#allocation4 + $0x1], 0  ;;  %s544_s9 = smov 0   ;;  %s546_s10 = smov 0  }
   0x5   :  { %s548_s11 = smov 0   ;;  %s550_s12 = smov 0  }
   0x6 LB: > { %s565_s13 = sadd.s32 4294967295, %s526_s12   ;;  %s319_s14 = sadd.s32 4294967294, %s526_s12   ;;  %s526_s12 = sphi %s550_s12, %s698_s12   ;;  %s522_s11 = sphi %s548_s11, %s697_s11   ;;  %s518_s10 = sphi %s546_s10, %s696_s10   ;;  %s514_s9 = sphi %s544_s9, %s695_s9  }
   0x7   : > { %p39_p0 = scmp.ne.s32.totalorder %s518_s10, %s514_s9  ;;  %p40_p1 = scmp.eq.s32.totalorder %s565_s13, 0 }
   0x8   : > { %p84_p2 = scmp.eq.s32.totalorder %s565_s13, 1  ;;  %p90_p3 = scmp.eq.s32.totalorder %s319_s14, 1 }
   0x9   : > { %p574_p4 = por %p40_p1, %p39_p0  ;;  %p320_p5 = scmp.ge.s32.totalorder %s526_s12, 1 }
   0xa   : > { %p579_p6 = por %p90_p3, %p39_p0  ;;  %p97_p7 = scmp.lt.s32.totalorder %s526_s12, 3 }
   0xb   : > { %s109_s19 = sshll.u32 %s687_s1, 4  ;;  %s528_s21 = smov [#allocation5]   ;;  %s110_s19 = int_to_ptr.hbm [resolvable:$true] %s109_s19 }
   0xc   : > { %p587_p8 = pnand %p320_p5, %p97_p7  ;;  %s111_s22 = sshll.u32 %s528_s21, 4  ;;  %s112_s22 = int_to_ptr.vmem [resolvable:$true] %s111_s22 }
   0xd   : > { %s597_s23 = sadd.s32 1, %s526_s12   ;;  %s26_s24 = sadd.s32 1, %s522_s11 }
   0xe   : > { %p341_p10 = pneg %p587_p8  ;;  %s23_s25 = ssub.s32 %s526_s12, %s597_s23 }
   0xf   : > { %p24_p12 = scmp.eq.s32.totalorder %s23_s25, 0  ;;  %p33_p13 = scmp.ne.s32.totalorder %s522_s11, %s518_s10 }
  0x10   : > { %p342_p11 = pnand %p341_p10, %p40_p1  ;;  %p34_p0 = scmp.eq.s32.totalorder %s526_s12, 0 }
  0x11   : > { %s606_s26 = scalar_select %p24_p12, %s522_s11, %s26_s24  }
  0x12   : > { %344 = dma.hbm_to_vmem [thread:$0]  (!%p342_p11), %s110_s19, 32, %s112_s22, [#allocation6]  }
  0x13   : > { %p610_p3 = por %p84_p2, %p33_p13  ;;  %p354_p5 = scmp.lt.s32.totalorder %s526_s12, 2 }
  0x14   : > { %s122_s28 = sand.u32 1, %s522_s11   ;;  %s324_s29 = sshll.u32 %s526_s12, 3 }
  0x15   : > { %p35_p7 = por %p34_p0, %p33_p13  ;;  %s323_s30 = sshll.u32 %s122_s28, 3 }
  0x16   : > { %s130_s5 = scalar_lea.hbm %s686_s0, %s324_s29  ;;  %s126_s7 = scalar_lea.vmem [#allocation2], %s323_s30 }
  0x17   : > { %s132_s6 = sshll.u32 %s130_s5, 4  ;;  %s134_s8 = sshll.u32 %s126_s7, 4  ;;  %s133_s6 = int_to_ptr.hbm [resolvable:$true] %s132_s6  ;;  %s135_s8 = int_to_ptr.vmem [resolvable:$true] %s134_s8 }
  0x18   : > { %p620_p10 = pnand %p354_p5, %p35_p7  ;;  %s123_s17 = scalar_lea.sflag [#allocation3], %s122_s28 }
  0x19   : > { %s426_s18 = sshra.s32 %s133_s6, 4  ;;  %s433_s24 = scalar_lea.hbm %s686_s0, 16  ;;  %s427_s18 = int_to_ptr.hbm [resolvable:$true] %s426_s18 }
  0x1a   : > { %s428_s19 = scalar_lea.hbm %s427_s18, 8  ;;  %p430_p11 = pneg %p620_p10 }
  0x1b   : > { %p429_p2 = scmp.ne.s32.totalorder %s427_s18, %s428_s19  ;;  %p434_p0 = scmp.lt.s32.totalorder %s427_s18, %s686_s0 }
  0x1c   : > { %p435_p5 = scmp.lt.s32.totalorder %s433_s24, %s428_s19 }
  0x1d   : > { %p431_p12 = pnand %p430_p11, %p429_p2 }
  0x1e   : > { %p436_p7 = por %p435_p5, %p434_p0 }
  0x1f   : > { %p432_p13 = pneg %p431_p12 }
  0x21   : > { %p437_p9 = pnand %p436_p7, %p432_p13 }
  0x23   : > { %440 = shalt.err (!%p437_p9)
}
  0x24   : > { %348 = dma.hbm_to_vmem [thread:$0]  (!%p620_p10), %s133_s6, 128, %s135_s8, %s123_s17  }
  0x25   : > { %143 = sbr.rel (%p587_p8) target bundleno = 337 (0x151), region = 28  ;;  %s637_s28 = sand.u32 (!%p587_p8), 1, %s518_s10  }
  0x26   : > { %s326_s30 = sshll.u32 (!%p587_p8), %s637_s28, 3  ;;  %s146_s3 = scalar_lea.sflag (!%p587_p8), [#allocation3], %s637_s28 }
  0x27   : > { %s149_s4 = scalar_lea.vmem (!%p587_p8), [#allocation2], %s326_s30 }
  0x2a   : > { %501 = dma.done.wait (%p574_p4), %s146_s3, 128  }
  0x2b   : > { %503 = vsyncadd (%p574_p4), %s146_s3, 4294967168 }
  0x2c   : > { %505 = dma.done.wait (%p40_p1), [#allocation6], 32  }
  0x2d   : > { %507 = vsyncadd (%p40_p1), [#allocation6], 4294967264  ;;  %v176_v0 = vld [vmem:[%s149_s4] sm:$0xff]  ;;  %s330_s15 = sshll.u32 %s565_s13, 3  ;;  %v390_v30 = vld [vmem:[#allocation5] ss:$0 sm:$0xff] }
  0x2e   : > { %179 = vadd.xlane.f32.xlu0 %v176_v0  ;;  %s234_s6 = scalar_lea.hbm %s688_s2, %s330_s15  ;;  %v391_v33 = vld [vmem:[#allocation5 + $0x1] ss:$0 sm:$0xff]  ;;  %s175_s7 = scalar_lea.vmem [#allocation7], %s326_s30 }
  0x2f   : > { %s236_s8 = sshll.u32 %s175_s7, 4  ;;  %s238_s13 = sshll.u32 %s234_s6, 4  ;;  %s237_s8 = int_to_ptr.vmem [resolvable:$true] %s236_s8  ;;  %s239_s13 = int_to_ptr.hbm [resolvable:$true] %s238_s13 }
  0x30   : > { %s224_s14 = scalar_lea.sflag [#allocation4], %s637_s28  ;;  %s470_s17 = sshra.s32 %s239_s13, 4  ;;  %s471_s17 = int_to_ptr.hbm [resolvable:$true] %s470_s17 }
  0x31   : > { %s472_s18 = scalar_lea.hbm %s471_s17, 8  ;;  %s476_s22 = scalar_lea.hbm %s688_s2, 16 }
  0x32   : > { %p473_p1 = scmp.ne.s32.totalorder %s471_s17, %s472_s18  ;;  %p477_p9 = scmp.lt.s32.totalorder %s471_s17, %s688_s2 }
  0x33   : > { %p478_p10 = scmp.lt.s32.totalorder %s476_s22, %s472_s18 }
  0x34   : > { %p474_p4 = pnand %p473_p1, %p610_p3 }
  0x35   : > { %p479_p2 = por %p478_p10, %p477_p9 }
  0x36   : > { %p475_p8 = pneg %p474_p4 }
  0x38   : > { %p480_p11 = pnand %p479_p2, %p475_p8 }
  0xa1   : > { %v180_v1 = vpop.xlane.xlu0 %179 }
  0xa2   : > { %v181_v2 = vmul.f32 0.03125, %v180_v1 }
  0xa4   : > { %v182_v3 = vsub.f32 %v176_v0, %v181_v2  ;;  %v186_v5 = vmul.f32 %v181_v2, %v181_v2 }
  0xa6   : > { %v183_v4 = vmul.f32 %v182_v3, %v182_v3  ;;  %v187_v6 = vmul.f32 96.0, %v186_v5 }
  0xa8   : > { %184 = vadd.xlane.f32.xlu0 %v183_v4 }
 0x11b   : > { %v185_v7 = vpop.xlane.xlu0 %184 }
 0x11c   : > { %v188_v8 = vsub.f32 %v185_v7, %v187_v6 }
 0x11e   : > { %v189_v9 = vmul.f32 0.032258064, %v188_v8 }
 0x120   : > { %392 = vrsqrt.f32 %v189_v9  ;;  %vm197_vm0 = vcmp.eq.f32.partialorder %v189_v9, inf  ;;  %v200_v17 = vand.u32 2147483648, %v189_v9  ;;  %vm199_vm1 = vcmp.eq.f32.partialorder %v189_v9, 0.0 }
 0x126   : > { %v393_v10 = vpop.eup %392 }
 0x127   : > { %v191_v11 = vmul.f32 %v393_v10, %v189_v9 }
 0x129   : > { %v192_v12 = vmul.f32 %v393_v10, %v191_v11 }
 0x12b   : > { %v193_v13 = vmul.f32 0.5, %v192_v12 }
 0x12d   : > { %v194_v14 = vsub.f32 1.5, %v193_v13 }
 0x12f   : > { %v195_v15 = vmul.f32 %v393_v10, %v194_v14 }
 0x131   : > { %v196_v16 = vmul.f32 %v195_v15, %v189_v9 }
 0x133   : > { %v198_v18 = vsel %vm197_vm0, %v189_v9, %v196_v16 }
 0x134   : > { %v201_v19 = vsel %vm199_vm1, %v200_v17, %v198_v18 }
 0x135   : > { %v202_v20 = vadd.f32 1e-06, %v201_v19 }
 0x137   : > { %394 = vrcp.f32 %v202_v20  ;;  %v214_v24 = vand.u32 2147483648, %v202_v20  ;;  %v212_v26 = vand.u32 2147483647, %v202_v20  ;;  %vm208_vm3 = vweird.f32 %v202_v20 }
 0x139   : > { %v215_v28 = vor.u32 1.1754944e-38, %v214_v24  ;;  %vm213_vm5 = vcmp.eq.f32.partialorder %v212_v26, 8.507059e+37 }
 0x13d   : > { %v395_v21 = vpop.eup %394 }
 0x13e   : > { %v204_v22 = vmul.f32 %v395_v21, %v202_v20  ;;  %vm209_vm2 = vweird.f32 %v395_v21 }
 0x13f   : > { %vm210_vm4 = vmor %vm208_vm3, %vm209_vm2 }
 0x140   : > { %v205_v23 = vsub.f32 1.0, %v204_v22 }
 0x142   : > { %v206_v25 = vmul.f32 %v395_v21, %v205_v23 }
 0x144   : > { %v207_v27 = vadd.f32 %v395_v21, %v206_v25 }
 0x146   : > { %v211_v29 = vsel %vm210_vm4, %v395_v21, %v207_v27 }
 0x147   : > { %v216_v31 = vsel %vm213_vm5, %v215_v28, %v211_v29 }
 0x148   : > { %v217_v32 = vmul.f32 %v216_v31, %v182_v3 }
 0x14a   : > { %v219_v34 = vmul.f32 %v390_v30, %v217_v32 }
 0x14c   : > { %v221_v35 = vadd.f32 %v391_v33, %v219_v34 }
 0x14e   : > { %222 = vst [vmem:[%s175_s7] sm:$0xff] %v221_v35 }
 0x14f   : > { %483 = shalt.err (!%p480_p11)
}
 0x150   : > { %339 = dma.vmem_to_hbm [thread:$0]  (%p610_p3), %s237_s8, 128, %s239_s13, %s224_s14  }
 0x151 PF: > { %s250_s29 = sand.u32 1, %s514_s9   ;;  %p694_p12 = scmp.ge.s32.totalorder %s526_s12, 2 }
 0x152   : > { %s251_s28 = scalar_lea.sflag [#allocation4], %s250_s29 }
 0x153   : > { %p350_p13 = pnand %p694_p12, %p579_p6 }
 0x155   : > { %p351_p0 = pneg %p350_p13 }
 0x157   : > { %509 = dma.done.wait (%p351_p0), %s251_s28, 128  }
 0x158   : > { %511 = vsyncadd (%p351_p0), %s251_s28, 4294967168  ;;  %p16_p5 = scmp.ge.s32.totalorder %s597_s23, 4   ;;  %s695_s9 = smov %s518_s10 }
 0x159   : > { %s696_s10 = smov %s522_s11  ;;  %s697_s11 = smov %s606_s26 }
 0x15a   : > { %s698_s12 = smov %s597_s23  ;;  %18 = sbr.rel (!%p16_p5) target bundleno = 6 (0x6), region = 77 }
 0x15f   :  { %257 = vsyncpa [#allocation3], 1 }
 0x160   :  { %259 = vsyncpa [#allocation3 + $0x1], 1 }
 0x161   :  { %260 = vsyncpa [#allocation6], 1 }
 0x162   :  { %261 = vsyncpa [#allocation4], 1 }
 0x163   :  { %263 = vsyncpa [#allocation4 + $0x1], 1 }

</bundles_post_ra>
